<compile_context>
chip_gen: v7x
topology: tpu7x:2x2x1
jax: 0.10.0
libtpu: 0.0.40
codegen_flags: <defaults>
</compile_context>

<pallas_src>
import jax
import jax.numpy as jnp
from jax import lax
from jax.experimental import pallas as pl
from jax.experimental.pallas import tpu as pltpu

EPS = 1e-6


def _adaln_zero_single_kernel(x_ref, emb_ref, out_ref):
    # x_ref / out_ref : (ts, D) VMEM tiles (batch dim squeezed)
    # emb_ref         : (3, D)  per-batch emb block (batch dim squeezed)
    x = x_ref[...].astype(jnp.float32)                       # (ts, D)
    shift = emb_ref[0:1, :].astype(jnp.float32)              # (1, D)
    scale = emb_ref[1:2, :].astype(jnp.float32)              # (1, D)

    # LayerNorm over last dim, elementwise_affine=False, eps=1e-6 (biased var).
    # One-pass statistics: var = E[x^2] - mean^2, clamped >= 0 to avoid NaNs
    # from cancellation when |mean| >> std.
    inv_d = jnp.float32(1.0 / x.shape[-1])
    s1 = jnp.sum(x, axis=-1, keepdims=True)
    s2 = jnp.sum(x * x, axis=-1, keepdims=True)
    mean = s1 * inv_d
    var = jnp.maximum(s2 * inv_d - mean * mean, 0.0)
    normed = (x - mean) * lax.rsqrt(var + EPS)               # f32 (ts, D)

    if out_ref.dtype == jnp.bfloat16:
        # Packed bf16 affine: halves VALU ops/elem on v6e/v7x where the VALU
        # slot (not DMA) is what saturates first for bf16 streams.
        one_plus_scale = (1.0 + scale).astype(jnp.bfloat16)
        shift_b = shift.astype(jnp.bfloat16)
        out_ref[...] = normed.astype(jnp.bfloat16) * one_plus_scale + shift_b
    else:
        out_ref[...] = (normed * (1.0 + scale) + shift).astype(out_ref.dtype)


def _pick_seq_tile(S: int, D: int, dtype, B: int) -> int:
    """Byte-targeted, sublane-aligned sequence tile.

    Targets ~4 MiB of x per tile so per-step DMA time dwarfs the ~0.35us fixed
    grid-step overhead at any D, while staying comfortably inside VMEM (incl.
    f32 temporaries) on v7x's 64 MiB parts.
    """
    itemsize = jnp.dtype(dtype).itemsize
    sub = 8 if itemsize >= 4 else (16 if itemsize == 2 else 32)
    target_bytes = 4 << 20
    target_rows = max(sub, target_bytes // max(1, D * itemsize))

    if S <= target_rows:
        ts = S                      # full-extent block is always layout-legal
    else:
        aligned_target = max(sub, (target_rows // sub) * sub)
        ts = 0
        # Prefer an exact, sublane-aligned divisor of S (no ragged last block).
        for cand in range(aligned_target, 0, -sub):
            if S % cand == 0:
                ts = cand
                break
        if ts == 0:
            # No aligned divisor <= target: use a ragged (pl.cdiv) grid with a
            # clipped last block instead of an oversized full-S tile.
            ts = aligned_target

    # v7x megacore hygiene: 2 TCs shard the parallel grid; when B is odd try
    # to make the number of sequence blocks even so neither core idles.
    if B % 2 == 1 and ts < S:
        n_blocks = -(-S // ts)
        if n_blocks % 2 == 1:
            half = max(sub, ((ts // 2) // sub) * sub)
            if half < ts and (-(-S // half)) % 2 == 0:
                ts = half
    return ts


def chroma_ada_layernorm_zero_single_pruned(x, emb, *, seq_tile=None,
                                            donate_x: bool = False):
    """x: (B, S, D), emb: (B, 3, D). Returns (x_out (B,S,D), gate_msa (B,D))."""
    B, S, D = x.shape
    assert emb.shape == (B, 3, D), f"expected emb shape {(B, 3, D)}, got {emb.shape}"

    ts = _pick_seq_tile(S, D, x.dtype, B) if seq_tile is None else int(seq_tile)
    ts = min(ts, S)
    n_seq_blocks = -(-S // ts)          # ragged last block is handled by Pallas
    grid = (B, n_seq_blocks)

    x_itemsize = jnp.dtype(x.dtype).itemsize
    emb_itemsize = jnp.dtype(emb.dtype).itemsize

    # VMEM budget: in + out double-buffered (x dtype) + ~3 f32 temporaries for
    # the upcast statistics/normalization path + tiny per-batch emb block
    # ((3,D) pads to (8,D), double-buffered) + slack. Capped at 48 MiB so the
    # scoped limit stays honest on v7x's 64 MiB physical VMEM.
    tile_bytes = ts * D * x_itemsize
    f32_tile_bytes = ts * D * 4
    emb_tile_bytes = 2 * 8 * D * emb_itemsize
    vmem_budget = 4 * tile_bytes + 3 * f32_tile_bytes + emb_tile_bytes + (2 << 20)
    vmem_budget = min(max(vmem_budget, 16 << 20), 48 << 20)

    cost = pl.CostEstimate(
        flops=8 * B * S * D,
        transcendentals=B * S,
        bytes_accessed=2 * B * S * D * x_itemsize + B * 3 * D * emb_itemsize,
    )

    kwargs = {}
    if donate_x:
        # Write x_out in place of x (only if the caller does not reuse x).
        kwargs["input_output_aliases"] = {0: 0}

    x_out = pl.pallas_call(
        _adaln_zero_single_kernel,
        out_shape=jax.ShapeDtypeStruct((B, S, D), x.dtype),
        grid_spec=pltpu.PrefetchScalarGridSpec(
            num_scalar_prefetch=0,
            grid=grid,
            in_specs=[
                # x: squeeze the unit batch dim -> kernel sees (ts, D)
                pl.BlockSpec((pl.Squeezed(), ts, D), lambda b, s: (b, s, 0)),
                # emb: per-batch (3, D) block; block index only changes at
                # batch boundaries (s innermost), so DMA re-issues once/batch.
                pl.BlockSpec((pl.Squeezed(), 3, D), lambda b, s: (b, 0, 0)),
            ],
            out_specs=pl.BlockSpec((pl.Squeezed(), ts, D), lambda b, s: (b, s, 0)),
        ),
        compiler_params=pltpu.CompilerParams(
            dimension_semantics=("parallel", "parallel"),
            vmem_limit_bytes=int(vmem_budget),
        ),
        cost_estimate=cost,
        **kwargs,
    )(x, emb)

    gate_msa = emb[:, 2, :]  # pure slice, no compute: keep in JAX glue
    return x_out, gate_msa


def _reference(x, emb):
    shift, scale, gate = jnp.split(emb.reshape(emb.shape[0], -1), 3, axis=1)
    xf = x.astype(jnp.float32)
    mean = jnp.mean(xf, axis=-1, keepdims=True)
    var = jnp.mean((xf - mean) ** 2, axis=-1, keepdims=True)
    normed = (xf - mean) / jnp.sqrt(var + EPS)
    out = normed * (1.0 + scale[:, None, :].astype(jnp.float32)) \
        + shift[:, None, :].astype(jnp.float32)
    return out.astype(x.dtype), gate


def _check(B, S, D, dtype, key, seq_tile=None, atol=2e-5, rtol=2e-5):
    kx, ke = jax.random.split(key)
    x = jax.random.normal(kx, (B, S, D), dtype=dtype)
    emb = jax.random.normal(ke, (B, 3, D), dtype=dtype)

    x_out, gate = chroma_ada_layernorm_zero_single_pruned(x, emb, seq_tile=seq_tile)
    jax.block_until_ready((x_out, gate))

    x_ref, gate_ref = _reference(x, emb)
    assert jnp.allclose(x_out.astype(jnp.float32), x_ref.astype(jnp.float32),
                        atol=atol, rtol=rtol), f"x mismatch at {(B, S, D, dtype)}"
    assert jnp.allclose(gate.astype(jnp.float32), gate_ref.astype(jnp.float32)), \
        f"gate mismatch at {(B, S, D, dtype)}"


if __name__ == "__main__":
    key = jax.random.PRNGKey(0)
    k0, k1, k2, k3 = jax.random.split(key, 4)

    # small shape consistent with the module (single full-sequence tile)
    _check(B=2, S=8, D=128, dtype=jnp.float32, key=k0)
    # explicit seq tile -> exercises multi-block sequence tiling (S // ts = 4)
    _check(B=2, S=1024, D=256, dtype=jnp.float32, key=k1, seq_tile=256)
    # non-divisible seq tile -> exercises ragged (pl.cdiv) grid path
    _check(B=1, S=320, D=128, dtype=jnp.float32, key=k2, seq_tile=128)
    # bf16 path (packed bf16 affine), looser tolerance
    _check(B=2, S=64, D=256, dtype=jnp.bfloat16, key=k3, atol=1e-1, rtol=5e-2)

    print("KERNEL_OK")
</pallas_src>

<mosaic_0001>
module attributes {stable_mosaic.version = 11 : i64} {
  func.func @_adaln_zero_single_kernel(%arg0: i32, %arg1: i32, %arg2: memref<1x8x128xf32, #tpu.memory_space<vmem>>, %arg3: memref<1x3x128xf32, #tpu.memory_space<vmem>>, %arg4: memref<1x8x128xf32, #tpu.memory_space<vmem>>) attributes {dimension_semantics = [#tpu.dimension_semantics<parallel>, #tpu.dimension_semantics<parallel>], iteration_bounds = array<i64: 2, 1>, scalar_prefetch = 0 : i64, scratch_operands = 0 : i64, tpu.core_type = #tpu.core_type<tc>, window_params = [{transform_indices = @transform_0, window_bounds = array<i64: 1, 8, 128>}, {transform_indices = @transform_1, window_bounds = array<i64: 1, 3, 128>}, {transform_indices = @transform_2, window_bounds = array<i64: 1, 8, 128>}]} {
    %c0 = arith.constant 0 : index
    %c0_0 = arith.constant 0 : index
    %c0_1 = arith.constant 0 : index
    %0 = vector.load %arg2[%c0, %c0_0, %c0_1] : memref<1x8x128xf32, #tpu.memory_space<vmem>>, vector<1x8x128xf32>
    %1 = vector.shape_cast %0 : vector<1x8x128xf32> to vector<8x128xf32>
    %c0_2 = arith.constant 0 : index
    %c0_3 = arith.constant 0 : index
    %c0_4 = arith.constant 0 : index
    %2 = vector.load %arg3[%c0_2, %c0_3, %c0_4] : memref<1x3x128xf32, #tpu.memory_space<vmem>>, vector<1x1x128xf32>
    %3 = vector.shape_cast %2 : vector<1x1x128xf32> to vector<1x128xf32>
    %c0_5 = arith.constant 0 : index
    %c1 = arith.constant 1 : index
    %c0_6 = arith.constant 0 : index
    %4 = vector.load %arg3[%c0_5, %c1, %c0_6] : memref<1x3x128xf32, #tpu.memory_space<vmem>>, vector<1x1x128xf32>
    %5 = vector.shape_cast %4 : vector<1x1x128xf32> to vector<1x128xf32>
    %cst = arith.constant dense<0.000000e+00> : vector<8xf32>
    %6 = vector.multi_reduction <add>, %1, %cst [1] : vector<8x128xf32> to vector<8xf32>
    %7 = vector.shape_cast %6 : vector<8xf32> to vector<8x1xf32>
    %8 = arith.mulf %1, %1 : vector<8x128xf32>
    %cst_7 = arith.constant dense<0.000000e+00> : vector<8xf32>
    %9 = vector.multi_reduction <add>, %8, %cst_7 [1] : vector<8x128xf32> to vector<8xf32>
    %10 = vector.shape_cast %9 : vector<8xf32> to vector<8x1xf32>
    %cst_8 = arith.constant 7.812500e-03 : f32
    %11 = vector.broadcast %cst_8 : f32 to vector<8x1xf32>
    %12 = arith.mulf %7, %11 : vector<8x1xf32>
    %cst_9 = arith.constant 7.812500e-03 : f32
    %13 = vector.broadcast %cst_9 : f32 to vector<8x1xf32>
    %14 = arith.mulf %10, %13 : vector<8x1xf32>
    %15 = arith.mulf %12, %12 : vector<8x1xf32>
    %16 = arith.subf %14, %15 : vector<8x1xf32>
    %cst_10 = arith.constant 0.000000e+00 : f32
    %17 = vector.broadcast %cst_10 : f32 to vector<8x1xf32>
    %18 = arith.maximumf %16, %17 : vector<8x1xf32>
    %19 = vector.broadcast %12 : vector<8x1xf32> to vector<8x128xf32>
    %20 = arith.subf %1, %19 : vector<8x128xf32>
    %cst_11 = arith.constant 9.99999997E-7 : f32
    %21 = vector.broadcast %cst_11 : f32 to vector<8x1xf32>
    %22 = arith.addf %18, %21 : vector<8x1xf32>
    %23 = math.rsqrt %22 : vector<8x1xf32>
    %24 = vector.broadcast %23 : vector<8x1xf32> to vector<8x128xf32>
    %25 = arith.mulf %20, %24 : vector<8x128xf32>
    %cst_12 = arith.constant 1.000000e+00 : f32
    %26 = vector.broadcast %cst_12 : f32 to vector<1x128xf32>
    %27 = arith.addf %26, %5 : vector<1x128xf32>
    %28 = vector.broadcast %27 : vector<1x128xf32> to vector<8x128xf32>
    %29 = arith.mulf %25, %28 : vector<8x128xf32>
    %30 = vector.broadcast %3 : vector<1x128xf32> to vector<8x128xf32>
    %31 = arith.addf %29, %30 : vector<8x128xf32>
    %c0_13 = arith.constant 0 : index
    %c0_14 = arith.constant 0 : index
    %c0_15 = arith.constant 0 : index
    %32 = vector.load %arg4[%c0_13, %c0_14, %c0_15] : memref<1x8x128xf32, #tpu.memory_space<vmem>>, vector<1x8x128xf32>
    %33 = vector.shape_cast %32 : vector<1x8x128xf32> to vector<8x128xf32>
    %34 = vector.shape_cast %31 : vector<8x128xf32> to vector<1x8x128xf32>
    tpu.vector_store %arg4[%c0_13, %c0_14, %c0_15], %34 {strides = array<i32>} : memref<1x8x128xf32, #tpu.memory_space<vmem>>, vector<1x8x128xf32>,
    return
  }
  func.func @transform_0(%arg0: i32, %arg1: i32) -> (i32, i32, i32) {
    %c0_i32 = arith.constant 0 : i32
    %c0_i32_0 = arith.constant 0 : i32
    return %arg0, %arg1, %c0_i32 : i32, i32, i32
  }
  func.func @transform_1(%arg0: i32, %arg1: i32) -> (i32, i32, i32) {
    %c0_i32 = arith.constant 0 : i32
    %c0_i32_0 = arith.constant 0 : i32
    %c0_i32_1 = arith.constant 0 : i32
    return %arg0, %c0_i32, %c0_i32_0 : i32, i32, i32
  }
  func.func @transform_2(%arg0: i32, %arg1: i32) -> (i32, i32, i32) {
    %c0_i32 = arith.constant 0 : i32
    %c0_i32_0 = arith.constant 0 : i32
    return %arg0, %arg1, %c0_i32 : i32, i32, i32
  }
}

</mosaic_0001>

<bundles_post_ra>
// kernel: tpu_custom_call.1
= control target key start
LH: loop header
LB: loop body
LE: loop exit
PB: predicated region body
PF: predicated region fallthrough
CT: control target
= control target key end

     0   :  { %7 = vsyncpa [#allocation3], 0  ;;  %s720_s0 = inlined_call_operand.hbm [shape: f32[2,8,128], index: 0, kind: input, shape index: {}]   ;;  %s721_s1 = inlined_call_operand.vmem [shape: f32[2,3,128], index: 1, kind: input, shape index: {}]   ;;  %s722_s2 = inlined_call_operand.hbm [shape: f32[2,8,128], index: 2, kind: output, shape index: {}]  }
   0x1   :  { %9 = vsyncpa [#allocation3 + $0x1], 0 }
   0x2   :  { %10 = vsyncpa [#allocation4], 0 }
   0x3   :  { %12 = vsyncpa [#allocation4 + $0x1], 0  ;;  %s539_s9 = smov 0   ;;  %s541_s10 = smov 0  }
   0x4   :  { %s543_s11 = smov 0   ;;  %s545_s12 = smov 0  }
   0x5   :  { %s547_s13 = smov 0   ;;  %s549_s14 = smov 0  }
   0x6 LB: > { %s329_s15 = sadd.s32 4294967295, %s520_s14   ;;  %s330_s16 = sadd.s32 4294967294, %s520_s14   ;;  %s520_s14 = sphi %s549_s14, %s18_s14   ;;  %s516_s13 = sphi %s547_s13, %s738_s13   ;;  %s512_s12 = sphi %s545_s12, %s737_s12   ;;  %s508_s11 = sphi %s543_s11, %s736_s11   ;;  %s504_s10 = sphi %s541_s10, %s735_s10   ;;  %s500_s9 = sphi %s539_s9, %s734_s9  }
   0x7   : > { %s30_s17 = sadd.s32 1, %s516_s13  ;;  %s39_s18 = sadd.s32 1, %s508_s11 }
   0x8   : > { %p32_p0 = scmp.ge.s32.totalorder %s30_s17, 2  ;;  %p46_p1 = scmp.ne.s32.totalorder %s508_s11, %s504_s10 }
   0x9   : > { %p47_p2 = scmp.eq.s32.totalorder %s520_s14, 0  ;;  %p52_p3 = scmp.ne.s32.totalorder %s504_s10, %s500_s9 }
   0xa   : > { %s740_s17 = smov (%p32_p0, %s30_s17), 0  ;;  %p53_p5 = scmp.eq.s32.totalorder %s329_s15, 0 }
   0xb   : > { %p580_p4 = por %p47_p2, %p46_p1  ;;  %s34_s20 = ssub.s32 %s516_s13, %s740_s17 }
   0xc   : > { %p104_p6 = scmp.eq.s32.totalorder %s329_s15, 1  ;;  %p37_p7 = scmp.eq.s32.totalorder %s34_s20, 0 }
   0xd   : > { %p586_p8 = por %p53_p5, %p52_p3  ;;  %p110_p10 = scmp.eq.s32.totalorder %s330_s16, 1 }
   0xe   : > { %p590_p9 = por %p104_p6, %p46_p1  ;;  %p356_p13 = scmp.lt.s32.totalorder %s520_s14, 2 }
   0xf   : > { %s595_s23 = scalar_select %p37_p7, %s508_s11, %s39_s18  }
  0x10   : > { %s726_s22 = scalar_select %p590_p9, 1, 0 }
  0x11   : > { %p597_p11 = por %p110_p10, %p52_p3  ;;  %s130_s25 = sand.u32 1, %s508_s11  }
  0x12   : > { %s333_s26 = sshll.u32 %s130_s25, 3  ;;  %s334_s27 = sshll.u32 %s516_s13, 7 }
  0x13   : > { %s727_s24 = scalar_select %p597_p11, 1, 0 }
  0x14   : > { %s608_s30 = scalar_lea.hbm %s720_s0, %s334_s27  ;;  %s134_s3 = scalar_lea.vmem [#allocation2], %s333_s26 }
  0x15   : > { %s142_s4 = sshll.u32 %s134_s3, 4  ;;  %p614_p0 = pnand %p356_p13, %p580_p4  ;;  %s610_s4 = int_to_ptr.vmem [resolvable:$true] %s142_s4 }
  0x16   : > { %s131_s6 = scalar_lea.sflag [#allocation3], %s130_s25  ;;  %s408_s7 = scalar_lea.hbm %s608_s30, 128 }
  0x17   : > { %p409_p3 = scmp.ne.s32.totalorder %s608_s30, %s408_s7  ;;  %p410_p5 = pneg %p614_p0 }
  0x18   : > { %s413_s16 = scalar_lea.hbm %s720_s0, 256  ;;  %p414_p4 = scmp.lt.u32.totalorder %s608_s30, %s720_s0 }
  0x19   : > { %p411_p6 = pnand %p410_p5, %p409_p3  ;;  %p415_p10 = scmp.lt.u32.totalorder %s413_s16, %s408_s7 }
  0x1a   : > { %p417_p12 = scmp.lt.u32.totalorder %s408_s7, %s608_s30 }
  0x1b   : > { %p412_p7 = pneg %p411_p6  ;;  %p416_p13 = por %p415_p10, %p414_p4 }
  0x1d   : > { %p418_p1 = por %p417_p12, %p416_p13 }
  0x1f   : > { %p419_p2 = pnand %p418_p1, %p412_p7 }
  0x21   : > { %422 = shalt.err (!%p419_p2)
}
  0x22   : > { %s423_s20 = scalar_lea.vmem %s610_s4, 128  ;;  %s522_s25 = smov [#allocation2]  }
  0x23   : > { %p424_p3 = scmp.ne.s32.totalorder %s610_s4, %s423_s20  ;;  %s428_s26 = sshll.u32 %s522_s25, 4  ;;  %s429_s26 = int_to_ptr.vmem [resolvable:$false] %s428_s26 }
  0x24   : > { %s430_s27 = scalar_lea.vmem %s429_s26, 256  ;;  %p431_p9 = scmp.lt.s32.totalorder %s610_s4, %s429_s26 }
  0x25   : > { %p426_p6 = pnand %p424_p3, %p410_p5  ;;  %p432_p4 = scmp.lt.s32.totalorder %s430_s27, %s423_s20 }
  0x27   : > { %p427_p11 = pneg %p426_p6  ;;  %p433_p10 = por %p432_p4, %p431_p9 }
  0x29   : > { %p434_p12 = pnand %p433_p10, %p427_p11 }
  0x2b   : > { %437 = shalt.err (!%p434_p12)
}
  0x2c   : > { %351 = dma.hbm_to_vmem [thread:$0]  (!%p614_p0), %s608_s30, 128, %s610_s4, %s131_s6  }
  0x2d   : > { %p729_p1 = scmp.lt.s32.totalorder %s520_s14, 3  ;;  %p730_p2 = scmp.ge.s32.totalorder %s520_s14, 1 }
  0x2f   : > { %p155_p5 = pnand %p730_p2, %p729_p1 }
  0x30   : > { %s650_s28 = sand.u32 (!%p155_p5), 1, %s504_s10  }
  0x31   : > { %158 = sbr.rel (%p155_p5) target bundleno = 243 (0xf3), region = 28  ;;  %s336_s29 = sshll.u32 (!%p155_p5), %s650_s28, 3 }
  0x32   : > { %s161_s3 = scalar_lea.sflag (!%p155_p5), [#allocation3], %s650_s28  ;;  %s164_s5 = scalar_lea.vmem (!%p155_p5), [#allocation2], %s336_s29 }
  0x38   : > { %491 = dma.done.wait (%p586_p8), %s161_s3, 128  }
  0x39   : > { %493 = vsyncadd (%p586_p8), %s161_s3, 4294967168  ;;  %v193_v0 = vld [vmem:[%s164_s5] sm:$0xff]  ;;  %p189_p9 = scmp.lt.s32.totalorder %s512_s12, 1  ;;  %v211_v9 = vlaneseq  ;;  %s341_s8 = sshll.u32 %s512_s12, 7 }
  0x3a   : > { %196 = vadd.xlane.f32.xlu0 %v193_v0  ;;  %v198_v1 = vmul.f32 %v193_v0, %v193_v0  ;;  %s188_s15 = scalar_lea.vmem [#allocation5], %s336_s29  ;;  %s671_s20 = scalar_lea.hbm %s722_s2, %s341_s8 }
  0x3b   : > { %s190_s30 = scalar_select %p189_p9, %s512_s12, 1  ;;  %v212_v11 = vshrl.u32 %v211_v9, 7 }
  0x3c   : > { %s237_s16 = sshll.u32 %s188_s15, 4  ;;  %s223_s25 = scalar_lea.sflag [#allocation4], %s650_s28  ;;  %s673_s16 = int_to_ptr.vmem [resolvable:$true] %s237_s16 }
  0x3d   : > { %s338_s4 = sshll.u32 %s190_s30, 2  ;;  %v213_v14 = vsub.s32 0, %v212_v11  ;;  %s438_s26 = scalar_lea.vmem %s673_s16, 128 }
  0x3e   : > { %199 = vadd.xlane.f32.xlu0 %v198_v1  ;;  %s192_s7 = scalar_lea.vmem %s721_s1, %s338_s4  ;;  %p439_p8 = scmp.ne.s32.totalorder %s673_s16, %s438_s26 }
  0x3f   : > { %v195_v12 = vld [vmem:[%s192_s7 + $0x1] sm:$0x1]  ;;  %v339_v19 = vld [vmem:[%s192_s7] ss:$0 sm:$0xff]  ;;  %p731_p11 = scmp.ne.s32.totalorder %s726_s22, 0  ;;  %s523_s12 = smov [#allocation5]  }
  0x40   : > { %v210_v13 = vadd.f32 1.0, %v195_v12  ;;  %s442_s27 = sshll.u32 %s523_s12, 4  ;;  %s443_s27 = int_to_ptr.vmem [resolvable:$false] %s442_s27 }
  0x41   : > { %p440_p0 = pnand %p439_p8, %p731_p11  ;;  %s444_s29 = scalar_lea.vmem %s443_s27, 256 }
  0x42   : > { %v214_v16 = vrot.slane %v210_v13, %v213_v14  ;;  %p445_p13 = scmp.lt.s32.totalorder %s673_s16, %s443_s27  ;;  %p446_p3 = scmp.lt.s32.totalorder %s444_s29, %s438_s26 }
  0x43   : > { %p441_p7 = pneg %p440_p0 }
  0x44   : > { %p447_p6 = por %p446_p3, %p445_p13 }
  0x46   : > { %p448_p4 = pnand %p447_p6, %p441_p7 }
  0xc7   : > { %v197_v2 = vpop.xlane.xlu0 %196 }
  0xc8   : > { %v201_v3 = vmul.f32 0.0078125, %v197_v2 }
  0xca   : > { %v203_v5 = vmul.f32 %v201_v3, %v201_v3  ;;  %v206_v15 = vsub.f32 %v193_v0, %v201_v3 }
  0xcb   : > { %v200_v4 = vpop.xlane.xlu0 %199 }
  0xcc   : > { %v202_v6 = vmul.f32 0.0078125, %v200_v4 }
  0xce   : > { %v204_v7 = vsub.f32 %v202_v6, %v203_v5 }
  0xd0   : > { %v205_v8 = vmax.f32 %v204_v7, 0.0 }
  0xd2   : > { %v207_v10 = vadd.f32 1e-06, %v205_v8 }
  0xd4   : > { %406 = vrsqrt.f32 %v207_v10 }
  0xde   : > { %v407_v17 = vpop.eup %406 }
  0xdf   : > { %v209_v18 = vmul.f32 %v407_v17, %v206_v15 }
  0xe1   : > { %v215_v20 = vmul.f32 %v214_v16, %v209_v18 }
  0xe3   : > { %v220_v21 = vadd.f32 %v339_v19, %v215_v20 }
  0xe5   : > { %221 = vst [vmem:[%s188_s15] sm:$0xff] %v220_v21 }
  0xe6   : > { %451 = shalt.err (!%p448_p4)
}
  0xe7   : > { %s452_s28 = scalar_lea.hbm %s671_s20, 128  ;;  %s456_s30 = scalar_lea.hbm %s722_s2, 256 }
  0xe8   : > { %p453_p10 = scmp.ne.s32.totalorder %s671_s20, %s452_s28  ;;  %p457_p2 = scmp.lt.u32.totalorder %s671_s20, %s722_s2 }
  0xe9   : > { %p458_p5 = scmp.lt.u32.totalorder %s456_s30, %s452_s28  ;;  %p460_p8 = scmp.lt.u32.totalorder %s452_s28, %s671_s20 }
  0xea   : > { %p454_p12 = pnand %p453_p10, %p731_p11 }
  0xeb   : > { %p459_p9 = por %p458_p5, %p457_p2 }
  0xec   : > { %p455_p1 = pneg %p454_p12 }
  0xed   : > { %p461_p0 = por %p460_p8, %p459_p9 }
  0xef   : > { %p462_p7 = pnand %p461_p0, %p455_p1 }
  0xf1   : > { %465 = shalt.err (!%p462_p7)
}
  0xf2   : > { %346 = dma.vmem_to_hbm [thread:$0]  (%p731_p11), %s673_s16, 128, %s671_s20, %s223_s25  }
  0xf3 PF: > { %s249_s6 = sand.u32 1, %s500_s9   ;;  %p732_p13 = scmp.ne.s32.totalorder %s727_s24, 0 }
  0xf4   : > { %p733_p3 = scmp.ge.s32.totalorder %s520_s14, 2  ;;  %s250_s7 = scalar_lea.sflag [#allocation4], %s249_s6 }
  0xf6   : > { %p353_p6 = pnand %p733_p3, %p732_p13 }
  0xf8   : > { %495 = dma.done.wait (!%p353_p6), %s250_s7, 128  }
  0xf9   : > { %497 = vsyncadd (!%p353_p6), %s250_s7, 4294967168  ;;  %s18_s14 = sadd.s32 1, %s520_s14   ;;  %s734_s9 = smov %s504_s10 }
  0xfa   : > { %p15_p4 = scmp.ge.s32.totalorder %s18_s14, 4   ;;  %s735_s10 = smov %s508_s11 }
  0xfb   : > { %s736_s11 = smov %s595_s23  ;;  %s737_s12 = smov %s516_s13 }
  0xfc   : > { %s738_s13 = smov %s740_s17  ;;  %17 = sbr.rel (!%p15_p4) target bundleno = 6 (0x6), region = 76 }
 0x103   :  { %255 = vsyncpa [#allocation3], 1 }
 0x104   :  { %257 = vsyncpa [#allocation3 + $0x1], 1 }
 0x105   :  { %258 = vsyncpa [#allocation4], 1 }
 0x106   :  { %260 = vsyncpa [#allocation4 + $0x1], 1 }

</bundles_post_ra>
